<compile_context>
chip_gen: v5e
topology: v5e:2x2
jax: 0.10.0
libtpu: 0.0.40
codegen_flags: <defaults>
</compile_context>

<pallas_src>
import functools

import jax
import jax.numpy as jnp
from jax import lax
from jax.experimental import pallas as pl
from jax.experimental.pallas import tpu as pltpu

# MXU operand dtype (bf16 on v6e/v7x); jnp.float32 recovers exact f32 conv.
COMPUTE_DTYPE = jnp.bfloat16


def _conv3x3_kernel(x_ref, w_ref, m_ref, o_ref, *, W):
    """3x3 / stride-1 / pad-1 conv over the whole batch as one K=9*Cin_pad matmul.

    x_ref : (Cin_pad, N)       channel-major input, N = B*H*W on the lane axis.
                               Row Cin is all-ones (bias row), rows > Cin zero.
    w_ref : (Cout, 9*Cin_pad)  im2col weights, tap-major: col = (dh*3+dw)*Cin_pad + ci.
                               Bias lives in the centre tap's "ones" column.
    m_ref : (8, N)             multiplicative zero-padding masks for the 8
                               non-centre taps (precomputed in the wrapper).
    o_ref : (Cout, N)          conv output, lane-dense (N multiple of 128).
    """
    N = x_ref.shape[1]
    x = x_ref[...]                                         # (Cin_pad, N) f32

    taps = []
    mi = 0
    for dh in range(3):                                    # static -> fully unrolled
        dy = dh - 1
        for dw in range(3):
            dx = dw - 1
            if dy == 0 and dx == 0:
                taps.append(x)                             # centre tap, no mask
                continue
            # out(p) reads x(p + s), s = dy*W + dx.  Lanes where the roll wraps
            # (image seam / array end) are exactly the lanes the mask zeroes.
            s = dy * W + dx
            tap = pltpu.roll(x, (-s) % N, axis=1)          # XLU, ~free slot
            tap = tap * m_ref[pl.ds(mi, 1), :]             # sublane-broadcast mul
            taps.append(tap)
            mi += 1

    # Taps are 8-row aligned -> this concat is pure placement (no shuffles).
    patches = jnp.concatenate(taps, axis=0)                # (9*Cin_pad, N) f32
    acc = jnp.dot(w_ref[...], patches.astype(w_ref.dtype),  # one MXU pass
                  preferred_element_type=jnp.float32)       # (Cout, N) f32
    o_ref[...] = acc.astype(o_ref.dtype)                   # lane-dense store


def conv3x3_bias_pallas(x_nchw, weight_oihw, bias, *, compute_dtype=COMPUTE_DTYPE):
    """Conv2d(k=3, s=1, p=1) + bias, PyTorch semantics.

    Returns the conv output flattened as (Cout, B*H*W) (channel-major, batch on
    the lane axis) so the wrapper only needs one permutation for PixelShuffle.
    """
    B, Cin, H, W = x_nchw.shape
    Cout = weight_oihw.shape[0]
    HW = H * W
    N = B * HW
    # Pad channels to a multiple of 8, reserving one slot for the bias "ones" row.
    cin_pad = ((Cin + 1 + 7) // 8) * 8

    # ---- input: (B, Cin, H, W) -> channel-major (cin_pad, B*HW) --------------
    x_cb = jnp.transpose(x_nchw.reshape(B, Cin, HW), (1, 0, 2)).reshape(Cin, N)
    x_pad = jnp.concatenate(
        [x_cb.astype(jnp.float32),
         jnp.ones((1, N), jnp.float32),                    # bias "ones" row
         jnp.zeros((cin_pad - Cin - 1, N), jnp.float32)],  # zero pad rows
        axis=0)                                            # (cin_pad, N)

    # ---- weights: OIHW -> (Cout, 9*cin_pad), bias folded into centre tap ----
    w_full = jnp.zeros((Cout, 3, 3, cin_pad), jnp.float32)
    w_full = w_full.at[:, :, :, :Cin].set(jnp.transpose(weight_oihw, (0, 2, 3, 1)))
    w_full = w_full.at[:, 1, 1, Cin].set(bias)             # centre tap, ones column
    w_mat = w_full.reshape(Cout, 9 * cin_pad).astype(compute_dtype)

    # ---- hoisted zero-padding masks for the 8 non-centre taps ---------------
    # Per-image row index via q = p % HW so the batch fold stays correct.
    p = jnp.arange(N, dtype=jnp.int32)
    q = p % HW
    hrow, wcol = q // W, q % W
    has = {(-1, 0): hrow >= 1, (1, 0): hrow <= H - 2,
           (0, -1): wcol >= 1, (0, 1): wcol <= W - 2}
    rows = []
    for dh in range(3):
        for dw in range(3):
            if dh == 1 and dw == 1:
                continue
            m = jnp.ones((N,), jnp.bool_)
            if dh != 1:
                m = m & has[(dh - 1, 0)]
            if dw != 1:
                m = m & has[(0, dw - 1)]
            rows.append(m)
    masks = jnp.stack(rows, 0).astype(jnp.float32)          # (8, N)

    kernel = functools.partial(_conv3x3_kernel, W=W)

    return pl.pallas_call(
        kernel,
        out_shape=jax.ShapeDtypeStruct((Cout, N), x_nchw.dtype),
        grid_spec=pltpu.PrefetchScalarGridSpec(
            num_scalar_prefetch=0,
            grid=(1,),                                     # whole batch, one step
            in_specs=[
                pl.BlockSpec((cin_pad, N), lambda i: (0, 0)),
                pl.BlockSpec((Cout, 9 * cin_pad), lambda i: (0, 0)),
                pl.BlockSpec((8, N), lambda i: (0, 0)),
            ],
            out_specs=pl.BlockSpec((Cout, N), lambda i: (0, 0)),
        ),
        compiler_params=pltpu.CompilerParams(
            dimension_semantics=("arbitrary",)),
    )(x_pad, w_mat, masks)


def _unfold_and_pixel_shuffle(conv_flat, B, H, W, r):
    """(Cout, B*H*W) channel-major conv output -> PixelShuffle'd (B, C, H*r, W*r)."""
    Cout = conv_flat.shape[0]
    C = Cout // (r * r)
    x = conv_flat.reshape(C, r, r, B, H, W)
    x = jnp.transpose(x, (3, 0, 4, 1, 5, 2))               # single XLA permutation
    return x.reshape(B, C, H * r, W * r)


@functools.partial(jax.jit, static_argnames=("up_scale",))
def upsample_ps(x_nchw, weight, bias, up_scale):
    B, _, H, W = x_nchw.shape
    conv_flat = conv3x3_bias_pallas(x_nchw, weight, bias)
    return _unfold_and_pixel_shuffle(conv_flat, B, H, W, up_scale)


# ---------------------------- pure-JAX reference -----------------------------
def _pixel_shuffle_nchw(x, r):
    B, Crr, H, W = x.shape
    C = Crr // (r * r)
    x = x.reshape(B, C, r, r, H, W)
    return jnp.transpose(x, (0, 1, 4, 2, 5, 3)).reshape(B, C, H * r, W * r)


def _reference(x, weight, bias, up_scale, compute_dtype):
    """Same precision policy as the kernel (compute_dtype operands, f32 acc)."""
    out = lax.conv_general_dilated(
        x.astype(compute_dtype), weight.astype(compute_dtype),
        window_strides=(1, 1), padding=((1, 1), (1, 1)),
        dimension_numbers=("NCHW", "OIHW", "NCHW"),
        preferred_element_type=jnp.float32)
    out = out + bias.astype(compute_dtype).astype(jnp.float32)[None, :, None, None]
    return _pixel_shuffle_nchw(out, up_scale)


if __name__ == "__main__":
    # Module config: UpsamplePS(in_channel=4, up_scale=2)
    in_channel = 4
    up_scale = 2
    out_channel = in_channel * 2 ** up_scale       # 16, divisible by up_scale^2

    B, H, W = 2, 16, 16
    key = jax.random.PRNGKey(0)
    kx, kw, kb = jax.random.split(key, 3)

    x = jax.random.normal(kx, (B, in_channel, H, W), dtype=jnp.float32)
    fan_in = in_channel * 3 * 3
    weight = jax.random.normal(
        kw, (out_channel, in_channel, 3, 3), dtype=jnp.float32) / jnp.sqrt(fan_in)
    bias = jax.random.normal(kb, (out_channel,), dtype=jnp.float32) * 0.1

    out = jax.block_until_ready(upsample_ps(x, weight, bias, up_scale))

    ref = _reference(x, weight, bias, up_scale, COMPUTE_DTYPE)
    assert out.shape == (B, in_channel, H * up_scale, W * up_scale), out.shape
    max_err = float(jnp.max(jnp.abs(out - ref)))
    assert jnp.allclose(out, ref, atol=1e-3, rtol=1e-3), f"mismatch: {max_err}"

    print("KERNEL_OK")
</pallas_src>

<mosaic_0001>
module attributes {stable_mosaic.version = 11 : i64} {
  func.func @_conv3x3_kernel(%arg0: i32, %arg1: memref<8x512xf32, #tpu.memory_space<vmem>>, %arg2: memref<16x72xbf16, #tpu.memory_space<vmem>>, %arg3: memref<8x512xf32, #tpu.memory_space<vmem>>, %arg4: memref<16x512xf32, #tpu.memory_space<vmem>>) attributes {dimension_semantics = [#tpu.dimension_semantics<arbitrary>], iteration_bounds = array<i64: 1>, scalar_prefetch = 0 : i64, scratch_operands = 0 : i64, tpu.core_type = #tpu.core_type<tc>, window_params = [{pipeline_mode = #tpu.pipeline_mode<synchronous>, transform_indices = @transform_0, window_bounds = array<i64: 8, 512>}, {pipeline_mode = #tpu.pipeline_mode<synchronous>, transform_indices = @transform_1, window_bounds = array<i64: 16, 72>}, {pipeline_mode = #tpu.pipeline_mode<synchronous>, transform_indices = @transform_2, window_bounds = array<i64: 8, 512>}, {pipeline_mode = #tpu.pipeline_mode<synchronous>, transform_indices = @transform_3, window_bounds = array<i64: 16, 512>}]} {
    %c0 = arith.constant 0 : index
    %c0_0 = arith.constant 0 : index
    %0 = vector.load %arg1[%c0, %c0_0] : memref<8x512xf32, #tpu.memory_space<vmem>>, vector<8x512xf32>
    %c17_i32 = arith.constant 17 : i32
    %1 = tpu.dynamic_rotate %0 by %c17_i32 dim 1 : vector<8x512xf32>, i32 -> vector<8x512xf32>
    %c0_1 = arith.constant 0 : index
    %c0_2 = arith.constant 0 : index
    %2 = vector.load %arg3[%c0_1, %c0_2] : memref<8x512xf32, #tpu.memory_space<vmem>>, vector<1x512xf32>
    %3 = vector.broadcast %2 : vector<1x512xf32> to vector<8x512xf32>
    %4 = arith.mulf %1, %3 : vector<8x512xf32>
    %c16_i32 = arith.constant 16 : i32
    %5 = tpu.dynamic_rotate %0 by %c16_i32 dim 1 : vector<8x512xf32>, i32 -> vector<8x512xf32>
    %c1 = arith.constant 1 : index
    %c0_3 = arith.constant 0 : index
    %6 = vector.load %arg3[%c1, %c0_3] : memref<8x512xf32, #tpu.memory_space<vmem>>, vector<1x512xf32>
    %7 = vector.broadcast %6 : vector<1x512xf32> to vector<8x512xf32>
    %8 = arith.mulf %5, %7 : vector<8x512xf32>
    %c15_i32 = arith.constant 15 : i32
    %9 = tpu.dynamic_rotate %0 by %c15_i32 dim 1 : vector<8x512xf32>, i32 -> vector<8x512xf32>
    %c2 = arith.constant 2 : index
    %c0_4 = arith.constant 0 : index
    %10 = vector.load %arg3[%c2, %c0_4] : memref<8x512xf32, #tpu.memory_space<vmem>>, vector<1x512xf32>
    %11 = vector.broadcast %10 : vector<1x512xf32> to vector<8x512xf32>
    %12 = arith.mulf %9, %11 : vector<8x512xf32>
    %c1_i32 = arith.constant 1 : i32
    %13 = tpu.dynamic_rotate %0 by %c1_i32 dim 1 : vector<8x512xf32>, i32 -> vector<8x512xf32>
    %c3 = arith.constant 3 : index
    %c0_5 = arith.constant 0 : index
    %14 = vector.load %arg3[%c3, %c0_5] : memref<8x512xf32, #tpu.memory_space<vmem>>, vector<1x512xf32>
    %15 = vector.broadcast %14 : vector<1x512xf32> to vector<8x512xf32>
    %16 = arith.mulf %13, %15 : vector<8x512xf32>
    %c511_i32 = arith.constant 511 : i32
    %17 = tpu.dynamic_rotate %0 by %c511_i32 dim 1 : vector<8x512xf32>, i32 -> vector<8x512xf32>
    %c4 = arith.constant 4 : index
    %c0_6 = arith.constant 0 : index
    %18 = vector.load %arg3[%c4, %c0_6] : memref<8x512xf32, #tpu.memory_space<vmem>>, vector<1x512xf32>
    %19 = vector.broadcast %18 : vector<1x512xf32> to vector<8x512xf32>
    %20 = arith.mulf %17, %19 : vector<8x512xf32>
    %c497_i32 = arith.constant 497 : i32
    %21 = tpu.dynamic_rotate %0 by %c497_i32 dim 1 : vector<8x512xf32>, i32 -> vector<8x512xf32>
    %c5 = arith.constant 5 : index
    %c0_7 = arith.constant 0 : index
    %22 = vector.load %arg3[%c5, %c0_7] : memref<8x512xf32, #tpu.memory_space<vmem>>, vector<1x512xf32>
    %23 = vector.broadcast %22 : vector<1x512xf32> to vector<8x512xf32>
    %24 = arith.mulf %21, %23 : vector<8x512xf32>
    %c496_i32 = arith.constant 496 : i32
    %25 = tpu.dynamic_rotate %0 by %c496_i32 dim 1 : vector<8x512xf32>, i32 -> vector<8x512xf32>
    %c6 = arith.constant 6 : index
    %c0_8 = arith.constant 0 : index
    %26 = vector.load %arg3[%c6, %c0_8] : memref<8x512xf32, #tpu.memory_space<vmem>>, vector<1x512xf32>
    %27 = vector.broadcast %26 : vector<1x512xf32> to vector<8x512xf32>
    %28 = arith.mulf %25, %27 : vector<8x512xf32>
    %c495_i32 = arith.constant 495 : i32
    %29 = tpu.dynamic_rotate %0 by %c495_i32 dim 1 : vector<8x512xf32>, i32 -> vector<8x512xf32>
    %c7 = arith.constant 7 : index
    %c0_9 = arith.constant 0 : index
    %30 = vector.load %arg3[%c7, %c0_9] : memref<8x512xf32, #tpu.memory_space<vmem>>, vector<1x512xf32>
    %31 = vector.broadcast %30 : vector<1x512xf32> to vector<8x512xf32>
    %32 = arith.mulf %29, %31 : vector<8x512xf32>
    %33 = tpu.concatenate %4, %8, %12, %16, %0, %20, %24, %28, %32 in 0 : vector<8x512xf32>, vector<8x512xf32>, vector<8x512xf32>, vector<8x512xf32>, vector<8x512xf32>, vector<8x512xf32>, vector<8x512xf32>, vector<8x512xf32>, vector<8x512xf32> -> vector<72x512xf32>
    %c0_10 = arith.constant 0 : index
    %c0_11 = arith.constant 0 : index
    %34 = vector.load %arg2[%c0_10, %c0_11] : memref<16x72xbf16, #tpu.memory_space<vmem>>, vector<16x72xbf16>
    %35 = arith.truncf %33 : vector<72x512xf32> to vector<72x512xbf16>
    %cst = arith.constant dense<0.000000e+00> : vector<16x512xf32>
    %36 = tpu.matmul %34, %35, %cst {dimension_numbers = #tpu.dot_dimension_numbers<[1], [0], [0], [1], [0, 0, 1, 1], [], []>} : vector<16x72xbf16>, vector<72x512xbf16>, vector<16x512xf32> -> vector<16x512xf32>
    %c0_12 = arith.constant 0 : index
    %c0_13 = arith.constant 0 : index
    %37 = vector.load %arg4[%c0_12, %c0_13] : memref<16x512xf32, #tpu.memory_space<vmem>>, vector<16x512xf32>
    tpu.vector_store %arg4[%c0_12, %c0_13], %36 {strides = array<i32>} : memref<16x512xf32, #tpu.memory_space<vmem>>, vector<16x512xf32>,
    return
  }
  func.func @transform_0(%arg0: i32) -> (i32, i32) {
    %c0_i32 = arith.constant 0 : i32
    %c0_i32_0 = arith.constant 0 : i32
    %c0_i32_1 = arith.constant 0 : i32
    return %c0_i32, %c0_i32_0 : i32, i32
  }
  func.func @transform_1(%arg0: i32) -> (i32, i32) {
    %c0_i32 = arith.constant 0 : i32
    %c0_i32_0 = arith.constant 0 : i32
    %c0_i32_1 = arith.constant 0 : i32
    return %c0_i32, %c0_i32_0 : i32, i32
  }
  func.func @transform_2(%arg0: i32) -> (i32, i32) {
    %c0_i32 = arith.constant 0 : i32
    %c0_i32_0 = arith.constant 0 : i32
    %c0_i32_1 = arith.constant 0 : i32
    return %c0_i32, %c0_i32_0 : i32, i32
  }
  func.func @transform_3(%arg0: i32) -> (i32, i32) {
    %c0_i32 = arith.constant 0 : i32
    %c0_i32_0 = arith.constant 0 : i32
    %c0_i32_1 = arith.constant 0 : i32
    return %c0_i32, %c0_i32_0 : i32, i32
  }
}

</mosaic_0001>

<bundles_post_ra>
// kernel: upsample_ps.1
= control target key start
LH: loop header
LB: loop body
LE: loop exit
PB: predicated region body
PF: predicated region fallthrough
CT: control target
= control target key end

     0   :  { %s380_s18 = smov 111   ;;  %s381_s19 = smov 113   ;;  %v27_v6 = vlaneseq  ;;  %vm275_vm1 = vcmask 1043456   ;;  %vm271_vm9 = vcmask 588800   ;;  %s645_s0 = inlined_call_operand.vmem [shape: f32[8,512], index: 0, kind: input, shape index: {}]   ;;  %s646_s2 = inlined_call_operand.vmem [shape: f32[8,512], index: 2, kind: input, shape index: {}]   ;;  %s647_s1 = inlined_call_operand.vmem [shape: bf16[16,72], index: 1, kind: input, shape index: {}]   ;;  %s648_s3 = inlined_call_operand.vmem [shape: f32[16,512], index: 3, kind: output, shape index: {}]  }
   0x1   :  { %v411_v0 = vld [vmem:[%s645_s0 + $0x18] sm:$0xff]  ;;  %v416_v1 = vld [vmem:[%s645_s0 + $0x10] sm:$0xff]  ;;  %v421_v2 = vld [vmem:[%s645_s0] sm:$0xff]  ;;  %s382_s20 = smov 112   ;;  %s383_s23 = smov 127  }
   0x2   :  { %222 = vrot.lane.b32.xlu1 %v411_v0, %s380_s18  ;;  %164 = vrot.lane.b32.xlu2 %v416_v1, %s381_s19  ;;  %v435_v3 = vld [vmem:[%s645_s0 + $0x8] sm:$0xff]  ;;  %s384_s24 = smov 15   ;;  %s385_s0 = smov 1   ;;  %v462_v7 = vand.u32 127, %v27_v6 }
   0x3   :  { %216 = vrot.lane.b32.xlu0 %v421_v2, %s380_s18  ;;  %s386_s25 = smov 17   ;;  %s387_s26 = smov 16   ;;  %v362_v8 = vld [vmem:[%s646_s2 + $0x7] ss:$8 sm:$0xf] }
   0x4   :  { %vm224_vm0 = vcmp.lt.s32.totalorder %v462_v7, 111  ;;  %v235_v10 = vperm.slane %v362_v8, 3  ;;  %v234_v17 = vperm.slane %v362_v8, 2  ;;  %v360_v22 = vld [vmem:[%s646_s2 + $0x5] ss:$8 sm:$0xf] }
   0x5   :  { %v361_v24 = vld [vmem:[%s646_s2 + $0x6] ss:$8 sm:$0xf]  ;;  %vm168_vm2 = vcmp.lt.s32.totalorder %v462_v7, 113  ;;  %v178_v26 = vperm.slane %v360_v22, 2  ;;  %vm196_vm3 = vcmp.lt.s32.totalorder %v462_v7, 112 }
   0x6   :  { %v206_v27 = vperm.slane %v361_v24, 2  ;;  %v179_v29 = vperm.slane %v360_v22, 3  ;;  %v207_v31 = vperm.slane %v361_v24, 3  ;;  %v232_v44 = vperm.slane %v362_v8, 0 }
   0x7   :  { %v233_v45 = vperm.slane %v362_v8, 1  ;;  %v205_v53 = vperm.slane %v361_v24, 1  ;;  %v504_v54 = vld [vmem:[%s646_s2 + $0x4] ss:$8 sm:$0xf]  ;;  %v204_v55 = vperm.slane %v361_v24, 0 }
   0x8   :  { %v176_v58 = vperm.slane %v360_v22, 0  ;;  %v177_v61 = vperm.slane %v360_v22, 1  ;;  %vm140_vm4 = vcmp.lt.s32.totalorder %v462_v7, 127  ;;  %v151_v6 = vperm.slane %v504_v54, 3 }
   0x9   :  { %vm84_vm5 = vcmp.lt.s32.totalorder %v462_v7, 15  ;;  %vm112_vm6 = vcmp.lt.s32.totalorder %v462_v7, 1  ;;  %vm29_vm7 = vcmp.lt.s32.totalorder %v462_v7, 17  ;;  %vm56_vm8 = vcmp.lt.s32.totalorder %v462_v7, 16 }
   0xa   :  { %166 = vrot.lane.b32.xlu2 %v411_v0, %s381_s19  ;;  %160 = vrot.lane.b32.xlu1 %v421_v2, %s381_s19 }
   0xb   :  { %220 = vrot.lane.b32.xlu0 %v416_v1, %s380_s18 }
  0x12   :  { %194 = vrot.lane.b32.xlu2 %v411_v0, %s382_s20  ;;  %192 = vrot.lane.b32.xlu1 %v416_v1, %s382_s20 }
  0x13   :  { %188 = vrot.lane.b32.xlu0 %v421_v2, %s382_s20 }
  0x1a   :  { %136 = vrot.lane.b32.xlu2 %v416_v1, %s383_s23  ;;  %132 = vrot.lane.b32.xlu1 %v421_v2, %s383_s23 }
  0x1b   :  { %218 = vrot.lane.b32.xlu0 %v435_v3, %s380_s18 }
  0x22   :  { %190 = vrot.lane.b32.xlu2 %v435_v3, %s382_s20  ;;  %162 = vrot.lane.b32.xlu1 %v435_v3, %s381_s19 }
  0x23   :  { %138 = vrot.lane.b32.xlu0 %v411_v0, %s383_s23 }
  0x2a   :  { %82 = vrot.lane.b32.xlu2 %v411_v0, %s384_s24  ;;  %80 = vrot.lane.b32.xlu1 %v416_v1, %s384_s24 }
  0x2b   :  { %78 = vrot.lane.b32.xlu0 %v435_v3, %s384_s24 }
  0x32   :  { %110 = vrot.lane.b32.xlu2 %v411_v0, %s385_s0  ;;  %108 = vrot.lane.b32.xlu1 %v416_v1, %s385_s0 }
  0x33   :  { %106 = vrot.lane.b32.xlu0 %v435_v3, %s385_s0 }
  0x3a   :  { %23 = vrot.lane.b32.xlu2 %v416_v1, %s386_s25  ;;  %21 = vrot.lane.b32.xlu1 %v435_v3, %s386_s25 }
  0x3b   :  { %134 = vrot.lane.b32.xlu0 %v435_v3, %s383_s23 }
  0x42   :  { %52 = vrot.lane.b32.xlu2 %v416_v1, %s387_s26  ;;  %50 = vrot.lane.b32.xlu1 %v435_v3, %s387_s26 }
  0x43   :  { %25 = vrot.lane.b32.xlu0 %v411_v0, %s386_s25 }
  0x4a   :  { %104 = vrot.lane.b32.xlu2 %v421_v2, %s385_s0  ;;  %76 = vrot.lane.b32.xlu1 %v421_v2, %s384_s24 }
  0x4b   :  { %54 = vrot.lane.b32.xlu0 %v411_v0, %s387_s26 }
  0x52   :  { %48 = vrot.lane.b32.xlu1 %v421_v2, %s387_s26 }
  0x53   :  { %19 = vrot.lane.b32.xlu0 %v421_v2, %s386_s25 }
  0x5c   :  { %v460_v4 = vpop.permute.xlu2 %164 }
  0x64   :  { %v167_v5 = vpop.permute.xlu2 %166 }
  0x65   :  { %v169_v28 = vsel %vm168_vm2, %v460_v4, %v167_v5 }
  0x66   :  { %v186_v36 = vmul.f32 %v178_v26, %v169_v28  ;;  %v538_v28 = vld [vmem:[%s646_s2 + $0x3] ss:$8 sm:$0xf] }
  0x6c   :  { %v195_v9 = vpop.permute.xlu2 %194 }
  0x74   :  { %v223_v11 = vpop.permute.xlu1 %222  ;;  %v471_v18 = vpop.permute.xlu2 %136 }
  0x75   :  { %v217_v12 = vpop.permute.xlu0 %216 }
  0x76   :  { %v228_v13 = vsel %vm224_vm0, %v223_v11, %v217_v12 }
  0x77   :  { %v243_v14 = vmul.f32 %v235_v10, %v228_v13 }
  0x79   :  { %v265_v15 = vpack.c.bf16 %v243_v14, %v243_v14 }
  0x7b   :  { %v286_v16 = vsel %vm275_vm1, %v265_v15, 0 }
  0x7c   :  { %333 = vmatpush.bf16.msra.mxu3 %v286_v16  ;;  %v161_v19 = vpop.permute.xlu1 %160  ;;  %v191_v37 = vpop.permute.xlu2 %190 }
  0x7d   :  { %v221_v20 = vpop.permute.xlu0 %220  ;;  %v172_v32 = vsel %vm168_vm2, %v167_v5, %v161_v19  ;;  %v150_v5 = vperm.slane %v504_v54, 2 }
  0x7e   :  { %v225_v21 = vsel %vm224_vm0, %v221_v20, %v223_v11  ;;  %v187_v40 = vmul.f32 %v179_v29, %v172_v32 }
  0x7f   :  { %v242_v23 = vmul.f32 %v234_v17, %v225_v21 }
  0x81   :  { %v264_v25 = vpack.c.bf16 %v242_v23, %v242_v23 }
  0x83   :  { %v283_v30 = vsel %vm275_vm1, %v264_v25, 0 }
  0x84   :  { %319 = vmatpush.bf16.msra.mxu2 %v283_v30  ;;  %v193_v33 = vpop.permute.xlu1 %192  ;;  %v499_v52 = vpop.permute.xlu2 %82 }
  0x85   :  { %v197_v34 = vsel %vm196_vm3, %v193_v33, %v195_v9  ;;  %v189_v35 = vpop.permute.xlu0 %188  ;;  %v198_v59 = vsel %vm196_vm3, %v191_v37, %v193_v33 }
  0x86   :  { %v214_v38 = vmul.f32 %v206_v27, %v197_v34  ;;  %v200_v39 = vsel %vm196_vm3, %v195_v9, %v189_v35  ;;  %v199_v60 = vsel %vm196_vm3, %v189_v35, %v191_v37  ;;  %v213_v9 = vmul.f32 %v205_v53, %v198_v59  ;;  %v533_v27 = vld [vmem:[%s646_s2 + $0x2] ss:$8 sm:$0xf]  ;;  %v569_v53 = vld [vmem:[%s646_s2] ss:$8 sm:$0xf] }
  0x87   :  { %v215_v41 = vmul.f32 %v207_v31, %v200_v39  ;;  %v212_v10 = vmul.f32 %v204_v55, %v199_v60  ;;  %v94_v30 = vperm.slane %v533_v27, 2  ;;  %v122_v31 = vperm.slane %v538_v28, 2 }
  0x88   :  { %v260_v42 = vpack.c.bf16 %v214_v38, %v186_v36 }
  0x89   :  { %v261_v43 = vpack.c.bf16 %v215_v41, %v187_v40 }
  0x8a   :  { %320 = vmatpush.bf16.msra.mxu2 %v260_v42 }
  0x8b   :  { %334 = vmatpush.bf16.msra.mxu3 %v261_v43 }
  0x8c   :  { %v493_v46 = vpop.permute.xlu1 %132 }
  0x8d   :  { %v219_v47 = vpop.permute.xlu0 %218 }
  0x8e   :  { %v226_v48 = vsel %vm224_vm0, %v219_v47, %v221_v20  ;;  %v227_v49 = vsel %vm224_vm0, %v217_v12, %v219_v47 }
  0x8f   :  { %v240_v50 = vmul.f32 %v232_v44, %v227_v49  ;;  %v241_v51 = vmul.f32 %v233_v45, %v226_v48  ;;  %v148_v44 = vperm.slane %v504_v54, 0  ;;  %v149_v45 = vperm.slane %v504_v54, 1  ;;  %v356_v54 = vld [vmem:[%s646_s2 + $0x1] ss:$8 sm:$0xf] }
  0x91   :  { %v262_v56 = vpack.c.bf16 %v240_v50, %v240_v50  ;;  %v263_v57 = vpack.c.bf16 %v241_v51, %v241_v51 }
  0x93   :  { %v277_v62 = vsel %vm275_vm1, %v262_v56, 0  ;;  %v280_v63 = vsel %vm275_vm1, %v263_v57, 0 }
  0x94   :  { %291 = vmatpush.bf16.msra.mxu0 %v277_v62  ;;  %305 = vmatpush.bf16.msra.mxu1 %v280_v63  ;;  %v163_v8 = vpop.permute.xlu1 %162 }
  0x95   :  { %v170_v11 = vsel %vm168_vm2, %v163_v8, %v460_v4  ;;  %v171_v12 = vsel %vm168_vm2, %v161_v19, %v163_v8  ;;  %v139_v13 = vpop.permute.xlu0 %138  ;;  %v111_v19 = vpop.permute.xlu2 %110  ;;  %v121_v8 = vperm.slane %v538_v28, 1 }
  0x96   :  { %v184_v14 = vmul.f32 %v176_v58, %v171_v12  ;;  %v185_v15 = vmul.f32 %v177_v61, %v170_v11  ;;  %v141_v16 = vsel %vm140_vm4, %v471_v18, %v139_v13  ;;  %v144_v17 = vsel %vm140_vm4, %v139_v13, %v493_v46 }
  0x97   :  { %v158_v20 = vmul.f32 %v150_v5, %v141_v16  ;;  %v159_v21 = vmul.f32 %v151_v6, %v144_v17  ;;  %v38_v58 = vperm.slane %v569_v53, 2  ;;  %v120_v6 = vperm.slane %v538_v28, 0 }
  0x98   :  { %v258_v22 = vpack.c.bf16 %v212_v10, %v184_v14  ;;  %v259_v23 = vpack.c.bf16 %v213_v9, %v185_v15  ;;  %v371_v9 = vld [vmem:[%s647_s1] sm:$0xff]  ;;  %v92_v11 = vperm.slane %v533_v27, 0  ;;  %v93_v12 = vperm.slane %v533_v27, 1 }
  0x99   :  { %v256_v4 = vpack.c.bf16 %v158_v20, %v416_v1  ;;  %v257_v24 = vpack.c.bf16 %v159_v21, %v411_v0  ;;  %v95_v0 = vperm.slane %v533_v27, 3  ;;  %v123_v1 = vperm.slane %v538_v28, 3 }
  0x9a   :  { %292 = vmatpush.bf16.msra.mxu0 %v258_v22  ;;  %306 = vmatpush.bf16.msra.mxu1 %v259_v23  ;;  %v39_v14 = vperm.slane %v569_v53, 3  ;;  %v67_v15 = vperm.slane %v356_v54, 3 }
  0x9b   :  { %321 = vmatpush.bf16.msra.mxu2 %v256_v4  ;;  %335 = vmatpush.bf16.msra.mxu3 %v257_v24 }
  0x9c   :  { %v81_v25 = vpop.permute.xlu1 %80 }
  0x9d   :  { %v528_v26 = vpop.permute.xlu0 %78  ;;  %v85_v29 = vsel %vm84_vm5, %v81_v25, %v499_v52  ;;  %v24_v32 = vpop.permute.xlu2 %23 }
  0x9e   :  { %v86_v33 = vsel %vm84_vm5, %v528_v26, %v81_v25  ;;  %v103_v37 = vmul.f32 %v95_v0, %v85_v29 }
  0x9f   :  { %v102_v40 = vmul.f32 %v94_v30, %v86_v33  ;;  %v65_v30 = vperm.slane %v356_v54, 1 }
  0xa4   :  { %v109_v34 = vpop.permute.xlu1 %108 }
  0xa5   :  { %v113_v35 = vsel %vm112_vm6, %v109_v34, %v111_v19  ;;  %v107_v36 = vpop.permute.xlu0 %106  ;;  %v53_v49 = vpop.permute.xlu2 %52 }
  0xa6   :  { %v131_v38 = vmul.f32 %v123_v1, %v113_v35  ;;  %v114_v39 = vsel %vm112_vm6, %v107_v36, %v109_v34 }
  0xa7   :  { %v130_v41 = vmul.f32 %v122_v31, %v114_v39  ;;  %v37_v31 = vperm.slane %v569_v53, 1 }
  0xa8   :  { %v253_v42 = vpack.c.bf16 %v131_v38, %v103_v37 }
  0xa9   :  { %v252_v43 = vpack.c.bf16 %v130_v41, %v102_v40 }
  0xaa   :  { %336 = vmatpush.bf16.msra.mxu3 %v253_v42 }
  0xab   :  { %322 = vmatpush.bf16.msra.mxu2 %v252_v43 }
  0xac   :  { %v558_v47 = vpop.permute.xlu1 %21 }
  0xad   :  { %v135_v48 = vpop.permute.xlu0 %134  ;;  %v31_v59 = vsel %vm29_vm7, %v558_v47, %v24_v32  ;;  %v105_v5 = vpop.permute.xlu2 %104 }
  0xae   :  { %v142_v50 = vsel %vm140_vm4, %v135_v48, %v471_v18  ;;  %v143_v51 = vsel %vm140_vm4, %v493_v46, %v135_v48  ;;  %v66_v46 = vperm.slane %v356_v54, 2  ;;  %v46_v63 = vmul.f32 %v38_v58, %v31_v59 }
  0xaf   :  { %v156_v55 = vmul.f32 %v148_v44, %v143_v51  ;;  %v157_v56 = vmul.f32 %v149_v45, %v142_v50  ;;  %v116_v10 = vsel %vm112_vm6, %v111_v19, %v105_v5  ;;  %v115_v13 = vsel %vm112_vm6, %v105_v5, %v107_v36 }
  0xb0   :  { %v128_v20 = vmul.f32 %v120_v6, %v116_v10  ;;  %v129_v4 = vmul.f32 %v121_v8, %v115_v13 }
  0xb1   :  { %v254_v57 = vpack.c.bf16 %v156_v55, %v421_v2  ;;  %v255_v18 = vpack.c.bf16 %v157_v56, %v435_v3 }
  0xb3   :  { %293 = vmatpush.bf16.msra.mxu0 %v254_v57  ;;  %307 = vmatpush.bf16.msra.mxu1 %v255_v18 }
  0xb4   :  { %v51_v60 = vpop.permute.xlu1 %50 }
  0xb5   :  { %v58_v61 = vsel %vm56_vm8, %v51_v60, %v53_v49  ;;  %v26_v62 = vpop.permute.xlu0 %25 }
  0xb6   :  { %v74_v2 = vmul.f32 %v66_v46, %v58_v61  ;;  %v30_v16 = vsel %vm29_vm7, %v24_v32, %v26_v62 }
  0xb7   :  { %v47_v27 = vmul.f32 %v39_v14, %v30_v16 }
  0xb8   :  { %v248_v3 = vpack.c.bf16 %v74_v2, %v46_v63 }
  0xba   :  { %323 = vmatpush.bf16.msra.mxu2 %v248_v3 }
  0xbc   :  { %v77_v17 = vpop.permute.xlu1 %76 }
  0xbd   :  { %v87_v21 = vsel %vm84_vm5, %v77_v17, %v528_v26  ;;  %v88_v22 = vsel %vm84_vm5, %v499_v52, %v77_v17  ;;  %v55_v23 = vpop.permute.xlu0 %54  ;;  %369 = vmatmul.msk.bf16.vlgmr.msra.gmra.mxu2 %vm271_vm9, %v371_v9  ;;  %v64_v26 = vperm.slane %v356_v54, 0  ;;  %v36_v52 = vperm.slane %v569_v53, 0 }
  0xbe   :  { %v100_v24 = vmul.f32 %v92_v11, %v88_v22  ;;  %v101_v19 = vmul.f32 %v93_v12, %v87_v21  ;;  %v57_v25 = vsel %vm56_vm8, %v53_v49, %v55_v23 }
  0xbf   :  { %v75_v28 = vmul.f32 %v67_v15, %v57_v25 }
  0xc0   :  { %v250_v0 = vpack.c.bf16 %v128_v20, %v100_v24  ;;  %v251_v1 = vpack.c.bf16 %v129_v4, %v101_v19 }
  0xc1   :  { %v249_v29 = vpack.c.bf16 %v75_v28, %v47_v27 }
  0xc2   :  { %294 = vmatpush.bf16.msra.mxu0 %v250_v0  ;;  %308 = vmatpush.bf16.msra.mxu1 %v251_v1 }
  0xc3   :  { %337 = vmatpush.bf16.msra.mxu3 %v249_v29 }
  0xc4   :  { %v49_v32 = vpop.permute.xlu1 %48 }
  0xc5   :  { %v59_v33 = vsel %vm56_vm8, %v49_v32, %v51_v60  ;;  %v60_v34 = vsel %vm56_vm8, %v55_v23, %v49_v32  ;;  %v20_v35 = vpop.permute.xlu0 %19 }
  0xc6   :  { %v72_v36 = vmul.f32 %v64_v26, %v60_v34  ;;  %v73_v37 = vmul.f32 %v65_v30, %v59_v33  ;;  %v32_v38 = vsel %vm29_vm7, %v20_v35, %v558_v47  ;;  %v33_v39 = vsel %vm29_vm7, %v26_v62, %v20_v35  ;;  %370 = vmatmul.msk.bf16.vlgmr.msra.gmra.mxu3 %vm271_vm9, %v371_v9 }
  0xc7   :  { %v44_v40 = vmul.f32 %v36_v52, %v33_v39  ;;  %v45_v41 = vmul.f32 %v37_v31, %v32_v38 }
  0xc9   :  { %v246_v42 = vpack.c.bf16 %v72_v36, %v44_v40  ;;  %v247_v43 = vpack.c.bf16 %v73_v37, %v45_v41 }
  0xcb   :  { %295 = vmatpush.bf16.msra.mxu0 %v246_v42  ;;  %309 = vmatpush.bf16.msra.mxu1 %v247_v43 }
  0xce   :  { %367 = vmatmul.msk.bf16.vlgmr.msra.gmra.mxu0 %vm271_vm9, %v371_v9  ;;  %368 = vmatmul.msk.bf16.vlgmr.msra.gmra.mxu1 %vm271_vm9, %v371_v9 }
 0x140   :  { %v325_v44 = vpop.f32.mrf.mxu2 }
 0x141   :  { %346 = vst [vmem:[%s648_s3 + $0x10] sm:$0xff] %v325_v44 }
 0x148   :  { %v327_v45 = vpop.f32.mrf.mxu2 }
 0x149   :  { %v339_v7 = vpop.f32.mrf.mxu3  ;;  %350 = vst [vmem:[%s648_s3 + $0x30] sm:$0xff] %v327_v45 }
 0x14a   :  { %347 = vst [vmem:[%s648_s3 + $0x18] sm:$0xff] %v339_v7 }
 0x14b   :  { %v297_v47 = vpop.f32.mrf.mxu0  ;;  %v311_v48 = vpop.f32.mrf.mxu1 }
 0x14c   :  { %344 = vst [vmem:[%s648_s3] sm:$0xff] %v297_v47 }
 0x14d   :  { %345 = vst [vmem:[%s648_s3 + $0x8] sm:$0xff] %v311_v48 }
 0x151   :  { %v341_v49 = vpop.f32.mrf.mxu3 }
 0x152   :  { %351 = vst [vmem:[%s648_s3 + $0x38] sm:$0xff] %v341_v49 }
 0x153   :  { %v299_v50 = vpop.f32.mrf.mxu0  ;;  %v313_v51 = vpop.f32.mrf.mxu1 }
 0x154   :  { %348 = vst [vmem:[%s648_s3 + $0x20] sm:$0xff] %v299_v50 }
 0x155   :  { %349 = vst [vmem:[%s648_s3 + $0x28] sm:$0xff] %v313_v51 }

</bundles_post_ra>
